<compile_context>
chip_gen: v5e
topology: v5e:2x2
jax: 0.10.0
libtpu: 0.0.40
codegen_flags: <defaults>
</compile_context>

<pallas_src>
import math

import jax
import jax.numpy as jnp
from jax.experimental import pallas as pl
from jax.experimental.pallas import tpu as pltpu


# ---------------- Pallas kernel: tiled FiLM affine (HBM-bound elementwise) ---

def film_affine_kernel(gamma_ref, beta_ref, x_ref, out_ref):
    # gamma/beta: (TILE_R, 1) f32, broadcast along the lane (spatial) axis of
    # the (TILE_R, TILE_L) activation tile.  Math in f32, cast only on store.
    out_ref[...] = (gamma_ref[...] * x_ref[...].astype(jnp.float32)
                    + beta_ref[...]).astype(out_ref.dtype)


def _pick_tiles(n_rows, n_lanes, itemsize, target_bytes):
    """Pick (TILE_R, TILE_L) from a per-grid-step byte target (not a lane cap).

    TILE_L: full extent, or a large multiple of 128 (lane-dense stores).
    TILE_R: full extent, or a multiple of the sublane packing (8 f32 / 16 bf16).
    """
    sub = max(8, 32 // max(1, itemsize))          # 8 f32, 16 bf16, 32 int8
    if n_lanes * sub * itemsize <= target_bytes:
        tile_l = n_lanes                          # full extent: always legal
    else:
        tile_l = (target_bytes // (sub * itemsize)) // 128 * 128
        tile_l = max(128, min(tile_l, (n_lanes // 128) * 128))
    rows = max(sub, target_bytes // max(1, tile_l * itemsize))
    rows = (rows // sub) * sub
    tile_r = n_rows if rows >= n_rows else rows   # full extent or multiple of sub
    return tile_r, tile_l


def film_forward(x, cond, params, *, target_tile_bytes=2 * 1024 * 1024):
    """x: (B, C, *spatial) (NCHW-style); cond: (B, D). Returns x.shape."""
    gw1, gw2, gb2, bw1, bw2, bb2 = params
    B, C = x.shape[0], x.shape[1]
    spatial = x.shape[2:]
    L = int(math.prod(spatial)) if spatial else 1
    P = gw2.shape[1]
    if P != C:
        raise ValueError(f"projection_dim ({P}) must equal channel dim ({C})")

    # ---- tiny conditioning MLPs: plain JAX, kept in float32 -----------------
    # O(B*D*P) flops; XLA fuses these.  Doing them outside the streaming kernel
    # removes a second pallas_call launch (review item) and keeps the
    # conditioning scale/shift in f32 regardless of x.dtype.
    cond32 = cond.astype(jnp.float32)
    gamma = (jnp.maximum(cond32 @ gw1.astype(jnp.float32), 0.0)
             @ gw2.astype(jnp.float32) + gb2.astype(jnp.float32))        # (B, P)
    beta = (jnp.maximum(cond32 @ bw1.astype(jnp.float32), 0.0)
            @ bw2.astype(jnp.float32) + bb2.astype(jnp.float32))         # (B, P)

    # ---- single streaming affine kernel over flattened (B*C, L) -------------
    N = B * C
    x_flat = x.reshape(N, L)
    gamma2 = gamma.reshape(N, 1)            # row i = (batch i//C, channel i%C)
    beta2 = beta.reshape(N, 1)

    tile_r, tile_l = _pick_tiles(N, L, x.dtype.itemsize, target_tile_bytes)
    grid = (pl.cdiv(N, tile_r), pl.cdiv(L, tile_l))   # l innermost: gamma/beta
                                                      # stay resident per row block
    out_flat = pl.pallas_call(
        film_affine_kernel,
        out_shape=jax.ShapeDtypeStruct((N, L), x.dtype),
        grid=grid,
        in_specs=[
            pl.BlockSpec((tile_r, 1), lambda r, l: (r, 0)),        # gamma (f32)
            pl.BlockSpec((tile_r, 1), lambda r, l: (r, 0)),        # beta  (f32)
            pl.BlockSpec((tile_r, tile_l), lambda r, l: (r, l)),   # x tile
        ],
        out_specs=pl.BlockSpec((tile_r, tile_l), lambda r, l: (r, l)),
        compiler_params=pltpu.CompilerParams(
            dimension_semantics=("parallel", "parallel"),
            vmem_limit_bytes=32 * 1024 * 1024),
    )(gamma2, beta2, x_flat)

    return out_flat.reshape(x.shape)


def film_reference(x, cond, params):
    gw1, gw2, gb2, bw1, bw2, bb2 = params
    gamma = jnp.maximum(cond @ gw1, 0.0) @ gw2 + gb2
    beta = jnp.maximum(cond @ bw1, 0.0) @ bw2 + bb2
    view = gamma.shape + (1,) * (x.ndim - 2)
    return gamma.reshape(view) * x + beta.reshape(view)


if __name__ == "__main__":
    # Small shapes consistent with the module: projection_dim == channels.
    B, C, H, W = 2, 8, 32, 32           # x: NCHW
    D = 16                              # conditional_dim
    P = C                               # projection_dim (must match channels)

    key = jax.random.PRNGKey(0)
    kx, kc, k1, k2, k3, k4, k5, k6 = jax.random.split(key, 8)

    x = jax.random.normal(kx, (B, C, H, W), dtype=jnp.float32)
    cond = jax.random.normal(kc, (B, D), dtype=jnp.float32)

    # Deterministic synthetic parameters, stored in (in, out) layout so the
    # wrapper computes y = h @ W (+ b).  (PyTorch stores Linear weight as
    # (out, in); this is the transposed, equivalent parameterization.)
    scale = 0.1
    gw1 = scale * jax.random.normal(k1, (D, P), dtype=jnp.float32)
    gw2 = scale * jax.random.normal(k2, (P, P), dtype=jnp.float32)
    gb2 = scale * jax.random.normal(k3, (P,), dtype=jnp.float32)
    bw1 = scale * jax.random.normal(k4, (D, P), dtype=jnp.float32)
    bw2 = scale * jax.random.normal(k5, (P, P), dtype=jnp.float32)
    bb2 = scale * jax.random.normal(k6, (P,), dtype=jnp.float32)
    params = (gw1, gw2, gb2, bw1, bw2, bb2)

    out = jax.block_until_ready(film_forward(x, cond, params))

    ref = film_reference(x, cond, params)
    assert out.shape == (B, C, H, W)
    assert jnp.allclose(out, ref, atol=1e-5, rtol=1e-5), "mismatch vs reference"

    print("KERNEL_OK")
</pallas_src>

<mosaic_0001>
module attributes {stable_mosaic.version = 11 : i64} {
  func.func @film_affine_kernel(%arg0: i32, %arg1: i32, %arg2: memref<16x1xf32, #tpu.memory_space<vmem>>, %arg3: memref<16x1xf32, #tpu.memory_space<vmem>>, %arg4: memref<16x1024xf32, #tpu.memory_space<vmem>>, %arg5: memref<16x1024xf32, #tpu.memory_space<vmem>>) attributes {dimension_semantics = [#tpu.dimension_semantics<parallel>, #tpu.dimension_semantics<parallel>], iteration_bounds = array<i64: 1, 1>, scalar_prefetch = 0 : i64, scratch_operands = 0 : i64, tpu.core_type = #tpu.core_type<tc>, window_params = [{transform_indices = @transform_0, window_bounds = array<i64: 16, 1>}, {transform_indices = @transform_1, window_bounds = array<i64: 16, 1>}, {transform_indices = @transform_2, window_bounds = array<i64: 16, 1024>}, {transform_indices = @transform_3, window_bounds = array<i64: 16, 1024>}]} {
    %c0 = arith.constant 0 : index
    %c0_0 = arith.constant 0 : index
    %0 = vector.load %arg2[%c0, %c0_0] : memref<16x1xf32, #tpu.memory_space<vmem>>, vector<16x1xf32>
    %c0_1 = arith.constant 0 : index
    %c0_2 = arith.constant 0 : index
    %1 = vector.load %arg4[%c0_1, %c0_2] : memref<16x1024xf32, #tpu.memory_space<vmem>>, vector<16x1024xf32>
    %2 = vector.broadcast %0 : vector<16x1xf32> to vector<16x1024xf32>
    %3 = arith.mulf %2, %1 : vector<16x1024xf32>
    %c0_3 = arith.constant 0 : index
    %c0_4 = arith.constant 0 : index
    %4 = vector.load %arg3[%c0_3, %c0_4] : memref<16x1xf32, #tpu.memory_space<vmem>>, vector<16x1xf32>
    %5 = vector.broadcast %4 : vector<16x1xf32> to vector<16x1024xf32>
    %6 = arith.addf %3, %5 : vector<16x1024xf32>
    %c0_5 = arith.constant 0 : index
    %c0_6 = arith.constant 0 : index
    %7 = vector.load %arg5[%c0_5, %c0_6] : memref<16x1024xf32, #tpu.memory_space<vmem>>, vector<16x1024xf32>
    tpu.vector_store %arg5[%c0_5, %c0_6], %6 {strides = array<i32>} : memref<16x1024xf32, #tpu.memory_space<vmem>>, vector<16x1024xf32>,
    return
  }
  func.func @transform_0(%arg0: i32, %arg1: i32) -> (i32, i32) {
    %c0_i32 = arith.constant 0 : i32
    %c0_i32_0 = arith.constant 0 : i32
    return %arg0, %c0_i32 : i32, i32
  }
  func.func @transform_1(%arg0: i32, %arg1: i32) -> (i32, i32) {
    %c0_i32 = arith.constant 0 : i32
    %c0_i32_0 = arith.constant 0 : i32
    return %arg0, %c0_i32 : i32, i32
  }
  func.func @transform_2(%arg0: i32, %arg1: i32) -> (i32, i32) {
    %c0_i32 = arith.constant 0 : i32
    return %arg0, %arg1 : i32, i32
  }
  func.func @transform_3(%arg0: i32, %arg1: i32) -> (i32, i32) {
    %c0_i32 = arith.constant 0 : i32
    return %arg0, %arg1 : i32, i32
  }
}

</mosaic_0001>

<bundles_post_ra>
// kernel: tpu_custom_call.1
= control target key start
LH: loop header
LB: loop body
LE: loop exit
PB: predicated region body
PF: predicated region fallthrough
CT: control target
= control target key end

     0   :  { %8 = vsyncpa [#allocation3], 0  ;;  %s246_s0 = inlined_call_operand.vmem [shape: f32[16,1], index: 0, kind: input, shape index: {}]   ;;  %s247_s1 = inlined_call_operand.vmem [shape: f32[16,1], index: 1, kind: input, shape index: {}]   ;;  %s248_s2 = inlined_call_operand.hbm [shape: f32[16,1024], index: 2, kind: input, shape index: {}]   ;;  %s249_s3 = inlined_call_operand.hbm [shape: f32[16,1024], index: 3, kind: output, shape index: {}]  }
   0x1   :  { %9 = vsyncpa [#allocation4], 0  ;;  %s18_s14 = sshll.u32 %s248_s2, 4  ;;  %s197_s15 = smov [#allocation2]   ;;  %s19_s14 = int_to_ptr.hbm [resolvable:$true] %s18_s14 }
   0x2   :  { %s20_s16 = sshll.u32 %s197_s15, 4  ;;  %s198_s17 = smov 1024   ;;  %s21_s16 = int_to_ptr.vmem [resolvable:$true] %s20_s16 }
   0x3   :  { %s199_s18 = smov 64  }
   0x4   :  { %26 = dma.hbm_to_vmem [thread:$0]  %s19_s14, 2048, %s21_s16, [#allocation3], %s198_s17, %s198_s17, %s199_s18  }
   0x5   :  { %193 = dma.done.wait [#allocation3], 2048  }
   0x6   :  { %194 = vsyncadd [#allocation3], 4294965248  ;;  %v200_v0 = vmov 0   ;;  %v75_v1 = vld [vmem:[%s247_s1] sm:$0xff]  ;;  %v76_v3 = vld [vmem:[%s247_s1 + $0x8] sm:$0xff]  ;;  %s125_s28 = sshll.u32 %s249_s3, 4  ;;  %s126_s28 = int_to_ptr.hbm [resolvable:$true] %s125_s28 }
   0x7   :  { %144 = vset.pattern.permute.xlu1 %v200_v0  ;;  %143 = vset.pattern.permute.xlu0 %v200_v0  ;;  %v31_v2 = vld [vmem:[%s246_s0] sm:$0xff]  ;;  %v32_v4 = vld [vmem:[%s246_s0 + $0x8] sm:$0xff]  ;;  %v35_v7 = vld [vmem:[#allocation2 + $0x10] sm:$0xff]  ;;  %s201_s0 = smov [#allocation5]  }
   0x8   :  { %79 = vperm.xlu1 %144, %v75_v1   ;;  %51 = vperm.xlu0 %143, %v31_v2   ;;  %v33_v5 = vld [vmem:[#allocation2] sm:$0xff]  ;;  %v34_v6 = vld [vmem:[#allocation2 + $0x8] sm:$0xff]  ;;  %v36_v8 = vld [vmem:[#allocation2 + $0x18] sm:$0xff]  ;;  %s123_s1 = sshll.u32 %s201_s0, 4  ;;  %s124_s1 = int_to_ptr.vmem [resolvable:$true] %s123_s1 }
   0x9   :  { %v37_v9 = vld [vmem:[#allocation2 + $0x20] sm:$0xff]  ;;  %v38_v10 = vld [vmem:[#allocation2 + $0x28] sm:$0xff]  ;;  %v39_v12 = vld [vmem:[#allocation2 + $0x30] sm:$0xff] }
   0xa   :  { %v40_v14 = vld [vmem:[#allocation2 + $0x38] sm:$0xff]  ;;  %v41_v28 = vld [vmem:[#allocation2 + $0x40] sm:$0xff]  ;;  %v42_v30 = vld [vmem:[#allocation2 + $0x48] sm:$0xff] }
   0xb   :  { %v43_v31 = vld [vmem:[#allocation2 + $0x50] sm:$0xff]  ;;  %v44_v32 = vld [vmem:[#allocation2 + $0x58] sm:$0xff]  ;;  %v45_v34 = vld [vmem:[#allocation2 + $0x60] sm:$0xff] }
   0xc   :  { %v46_v35 = vld [vmem:[#allocation2 + $0x68] sm:$0xff]  ;;  %v47_v37 = vld [vmem:[#allocation2 + $0x70] sm:$0xff]  ;;  %v48_v39 = vld [vmem:[#allocation2 + $0x78] sm:$0xff] }
  0x10   :  { %84 = vperm.xlu1 %144, %v76_v3   ;;  %56 = vperm.xlu0 %143, %v32_v4  }
  0x7a   :  { %v80_v11 = vpop.permute.xlu1 %79  ;;  %v52_v13 = vpop.permute.xlu0 %51 }
  0x7b   :  { %v59_v15 = vmul.f32 %v52_v13, %v33_v5  ;;  %v60_v16 = vmul.f32 %v52_v13, %v34_v6  ;;  %v61_v17 = vmul.f32 %v52_v13, %v35_v7  ;;  %v62_v18 = vmul.f32 %v52_v13, %v36_v8 }
  0x7c   :  { %v63_v19 = vmul.f32 %v52_v13, %v37_v9  ;;  %v64_v20 = vmul.f32 %v52_v13, %v38_v10  ;;  %v65_v21 = vmul.f32 %v52_v13, %v39_v12  ;;  %v66_v25 = vmul.f32 %v52_v13, %v40_v14 }
  0x7d   :  { %v87_v22 = vadd.f32 %v80_v11, %v59_v15  ;;  %v88_v23 = vadd.f32 %v80_v11, %v60_v16  ;;  %v89_v24 = vadd.f32 %v80_v11, %v61_v17  ;;  %v90_v26 = vadd.f32 %v80_v11, %v62_v18 }
  0x7e   :  { %v91_v27 = vadd.f32 %v80_v11, %v63_v19  ;;  %v92_v29 = vadd.f32 %v80_v11, %v64_v20  ;;  %v93_v33 = vadd.f32 %v80_v11, %v65_v21  ;;  %v94_v36 = vadd.f32 %v80_v11, %v66_v25 }
  0x7f   :  { %103 = vst [vmem:[#allocation5] sm:$0xff] %v87_v22 }
  0x80   :  { %104 = vst [vmem:[#allocation5 + $0x8] sm:$0xff] %v88_v23 }
  0x81   :  { %105 = vst [vmem:[#allocation5 + $0x10] sm:$0xff] %v89_v24 }
  0x82   :  { %106 = vst [vmem:[#allocation5 + $0x18] sm:$0xff] %v90_v26  ;;  %v57_v38 = vpop.permute.xlu0 %56  ;;  %v85_v44 = vpop.permute.xlu1 %84 }
  0x83   :  { %107 = vst [vmem:[#allocation5 + $0x20] sm:$0xff] %v91_v27  ;;  %v67_v40 = vmul.f32 %v57_v38, %v41_v28  ;;  %v68_v41 = vmul.f32 %v57_v38, %v42_v30  ;;  %v69_v42 = vmul.f32 %v57_v38, %v43_v31  ;;  %v70_v43 = vmul.f32 %v57_v38, %v44_v32 }
  0x84   :  { %108 = vst [vmem:[#allocation5 + $0x28] sm:$0xff] %v92_v29  ;;  %v71_v45 = vmul.f32 %v57_v38, %v45_v34  ;;  %v72_v46 = vmul.f32 %v57_v38, %v46_v35  ;;  %v73_v47 = vmul.f32 %v57_v38, %v47_v37  ;;  %v74_v51 = vmul.f32 %v57_v38, %v48_v39 }
  0x85   :  { %109 = vst [vmem:[#allocation5 + $0x30] sm:$0xff] %v93_v33  ;;  %v95_v48 = vadd.f32 %v85_v44, %v67_v40  ;;  %v96_v49 = vadd.f32 %v85_v44, %v68_v41  ;;  %v97_v50 = vadd.f32 %v85_v44, %v69_v42  ;;  %v98_v52 = vadd.f32 %v85_v44, %v70_v43 }
  0x86   :  { %110 = vst [vmem:[#allocation5 + $0x38] sm:$0xff] %v94_v36  ;;  %v99_v53 = vadd.f32 %v85_v44, %v71_v45  ;;  %v100_v54 = vadd.f32 %v85_v44, %v72_v46  ;;  %v101_v55 = vadd.f32 %v85_v44, %v73_v47  ;;  %v102_v56 = vadd.f32 %v85_v44, %v74_v51 }
  0x87   :  { %111 = vst [vmem:[#allocation5 + $0x40] sm:$0xff] %v95_v48 }
  0x88   :  { %112 = vst [vmem:[#allocation5 + $0x48] sm:$0xff] %v96_v49 }
  0x89   :  { %113 = vst [vmem:[#allocation5 + $0x50] sm:$0xff] %v97_v50 }
  0x8a   :  { %114 = vst [vmem:[#allocation5 + $0x58] sm:$0xff] %v98_v52 }
  0x8b   :  { %115 = vst [vmem:[#allocation5 + $0x60] sm:$0xff] %v99_v53 }
  0x8c   :  { %116 = vst [vmem:[#allocation5 + $0x68] sm:$0xff] %v100_v54 }
  0x8d   :  { %117 = vst [vmem:[#allocation5 + $0x70] sm:$0xff] %v101_v55 }
  0x8e   :  { %118 = vst [vmem:[#allocation5 + $0x78] sm:$0xff] %v102_v56 }
  0x8f   :  { %131 = dma.vmem_to_hbm [thread:$0]  %s124_s1, 2048, %s126_s28, [#allocation4], %s198_s17, %s198_s17, %s199_s18  }
  0x90   :  { %195 = dma.done.wait [#allocation4], 2048  }
  0x91   :  { %196 = vsyncadd [#allocation4], 4294965248 }
  0x92   :  { %136 = vsyncpa [#allocation3], 1 }
  0x93   :  { %137 = vsyncpa [#allocation4], 1 }

</bundles_post_ra>
